<compile_context>
chip_gen: v5e
topology: v5e:2x2
jax: 0.10.0
libtpu: 0.0.40
codegen_flags: <defaults>
</compile_context>

<pallas_src>
import math
import functools

import jax
import jax.numpy as jnp
import numpy as np
from jax import lax
from jax.experimental import pallas as pl
from jax.experimental.pallas import tpu as pltpu


_MASK_VALUE = -1e30  # large finite negative (robust vs -inf -> NaN)


def _attn_kernel(x_ref, wq_ref, wk_ref, wv_ref, bq_ref, bk_ref, bv_ref,
                 wp_ref, bp_ref, o_ref, *, n_head, head_dim, matmul_dtype):
    # x_ref block: (1, T, C) — one batch element.
    T, C = x_ref.shape[1], x_ref.shape[2]
    H, hd = n_head, head_dim
    scale = 1.0 / math.sqrt(hd)

    # --- load activations, cast matmul operands to bf16 (accumulate in f32) ---
    x = x_ref[0].astype(matmul_dtype)                 # (T, C)
    xb = jnp.broadcast_to(x, (H, T, C))               # (H, T, C), hoisted once

    # --- QKV projection: one head-batched MXU contraction per tensor ---------
    # weights are (H, C, hd), biases (H, 1, hd) in f32.
    q = jnp.einsum('htc,hcd->htd', xb, wq_ref[...],
                   preferred_element_type=jnp.float32) + bq_ref[...]
    k = jnp.einsum('htc,hcd->htd', xb, wk_ref[...],
                   preferred_element_type=jnp.float32) + bk_ref[...]
    v = jnp.einsum('htc,hcd->htd', xb, wv_ref[...],
                   preferred_element_type=jnp.float32) + bv_ref[...]

    # --- attention scores for all heads at once: (H, T, T) ------------------
    att = jnp.einsum('htd,hsd->hts',
                     q.astype(matmul_dtype), k.astype(matmul_dtype),
                     preferred_element_type=jnp.float32) * scale

    # causal mask built in-kernel (the PyTorch tril buffer equivalent)
    row = lax.broadcasted_iota(jnp.int32, (H, T, T), 1)
    col = lax.broadcasted_iota(jnp.int32, (H, T, T), 2)
    att = jnp.where(col <= row, att, _MASK_VALUE)

    # numerically stable softmax in f32
    m = jnp.max(att, axis=-1, keepdims=True)
    p = jnp.exp(att - m)
    l = jnp.sum(p, axis=-1, keepdims=True)
    inv = pl.reciprocal(l, approx=True)               # EUP, not VALU divide

    # --- attn @ V, normalisation folded in afterwards: (H, T, hd) ------------
    y = jnp.einsum('hts,hsd->htd',
                   p.astype(matmul_dtype), v.astype(matmul_dtype),
                   preferred_element_type=jnp.float32) * inv

    # --- output projection: per-head partial products, summed over heads -----
    # wp_ref is (H, hd, C);  sum_h y_h @ Wp_h  ==  concat(y_h) @ Wp
    yp = jnp.einsum('htd,hdc->htc', y.astype(matmul_dtype), wp_ref[...],
                    preferred_element_type=jnp.float32)          # (H, T, C)
    out = jnp.sum(yp, axis=0) + bp_ref[...]                      # (T, C) + (1, C)

    o_ref[0] = out.astype(o_ref.dtype)


def causal_self_attention(x, w_attn, b_attn, w_proj, b_proj, *, n_head,
                          matmul_dtype=jnp.bfloat16):
    """GPT CausalSelfAttention forward.

    x:       (B, T, C)
    w_attn:  (3C, C)  — PyTorch nn.Linear layout (out, in) for c_attn
    b_attn:  (3C,)
    w_proj:  (C, C)   — PyTorch layout (out, in) for c_proj
    b_proj:  (C,)
    """
    B, T, C = x.shape
    assert C % n_head == 0
    H = n_head
    hd = C // H

    # ---- host-side (free) weight re-layout into head-major form -------------
    # (3C, C) -> (C, 3C) -> (C, 3, H, hd) -> (3, H, C, hd)
    w_qkv = jnp.transpose(w_attn).reshape(C, 3, H, hd).transpose(1, 2, 0, 3)
    w_qkv = w_qkv.astype(matmul_dtype)
    wq, wk, wv = w_qkv[0], w_qkv[1], w_qkv[2]
    b_qkv = b_attn.reshape(3, H, 1, hd).astype(jnp.float32)
    bq, bk, bv = b_qkv[0], b_qkv[1], b_qkv[2]
    wp = jnp.transpose(w_proj).reshape(H, hd, C).astype(matmul_dtype)
    bp = b_proj.reshape(1, C).astype(jnp.float32)

    kernel = functools.partial(_attn_kernel, n_head=H, head_dim=hd,
                               matmul_dtype=matmul_dtype)

    return pl.pallas_call(
        kernel,
        out_shape=jax.ShapeDtypeStruct((B, T, C), x.dtype),
        grid_spec=pltpu.PrefetchScalarGridSpec(
            num_scalar_prefetch=0,
            grid=(B,),
            in_specs=[
                pl.BlockSpec((1, T, C), lambda b: (b, 0, 0)),    # x
                pl.BlockSpec((H, C, hd), lambda b: (0, 0, 0)),   # Wq (head-major)
                pl.BlockSpec((H, C, hd), lambda b: (0, 0, 0)),   # Wk
                pl.BlockSpec((H, C, hd), lambda b: (0, 0, 0)),   # Wv
                pl.BlockSpec((H, 1, hd), lambda b: (0, 0, 0)),   # bq
                pl.BlockSpec((H, 1, hd), lambda b: (0, 0, 0)),   # bk
                pl.BlockSpec((H, 1, hd), lambda b: (0, 0, 0)),   # bv
                pl.BlockSpec((H, hd, C), lambda b: (0, 0, 0)),   # Wproj (head-major)
                pl.BlockSpec((1, C), lambda b: (0, 0)),          # bproj
            ],
            out_specs=pl.BlockSpec((1, T, C), lambda b: (b, 0, 0)),
        ),
        compiler_params=pltpu.CompilerParams(
            dimension_semantics=("parallel",)),
    )(x, wq, wk, wv, bq, bk, bv, wp, bp)


def _reference(x, w_attn, b_attn, w_proj, b_proj, n_head):
    """Pure-JAX f32 reference mirroring the PyTorch forward."""
    B, T, C = x.shape
    hd = C // n_head
    qkv = jnp.einsum("btc,oc->bto", x, w_attn) + b_attn
    q, k, v = jnp.split(qkv, 3, axis=-1)

    def heads(t):
        return t.reshape(B, T, n_head, hd).transpose(0, 2, 1, 3)  # (B,H,T,hd)

    q, k, v = heads(q), heads(k), heads(v)
    att = jnp.einsum("bhtd,bhsd->bhts", q, k) * (1.0 / math.sqrt(hd))
    mask = jnp.tril(jnp.ones((T, T), dtype=bool))
    att = jnp.where(mask[None, None], att, -jnp.inf)
    att = jax.nn.softmax(att, axis=-1)
    y = jnp.einsum("bhts,bhsd->bhtd", att, v)
    y = y.transpose(0, 2, 1, 3).reshape(B, T, C)
    return jnp.einsum("btc,oc->bto", y, w_proj) + b_proj


if __name__ == "__main__":
    # Small GPT block config: n_embd=32, n_head=4, seq T=8, batch B=2.
    B, T, C, n_head = 2, 8, 32, 4

    key = jax.random.PRNGKey(0)
    k_x, k_wa, k_ba, k_wp, k_bp = jax.random.split(key, 5)

    s = 1.0 / math.sqrt(C)
    x = jax.random.normal(k_x, (B, T, C), jnp.float32)
    w_attn = s * jax.random.normal(k_wa, (3 * C, C), jnp.float32)   # (out, in)
    b_attn = 0.1 * jax.random.normal(k_ba, (3 * C,), jnp.float32)
    w_proj = s * jax.random.normal(k_wp, (C, C), jnp.float32)       # (out, in)
    b_proj = 0.1 * jax.random.normal(k_bp, (C,), jnp.float32)

    out = causal_self_attention(x, w_attn, b_attn, w_proj, b_proj,
                                n_head=n_head)
    out = jax.block_until_ready(out)

    # Tolerance reflects bf16 matmul operands + approximate reciprocal in the
    # kernel vs. a pure f32 reference.
    ref = _reference(x, w_attn, b_attn, w_proj, b_proj, n_head)
    np.testing.assert_allclose(np.asarray(out), np.asarray(ref),
                               rtol=5e-2, atol=5e-2)

    print("KERNEL_OK")
</pallas_src>

<mosaic_0001>
module attributes {stable_mosaic.version = 11 : i64} {
  func.func @_attn_kernel(%arg0: i32, %arg1: memref<1x8x32xf32, #tpu.memory_space<vmem>>, %arg2: memref<4x32x8xbf16, #tpu.memory_space<vmem>>, %arg3: memref<4x32x8xbf16, #tpu.memory_space<vmem>>, %arg4: memref<4x32x8xbf16, #tpu.memory_space<vmem>>, %arg5: memref<4x1x8xf32, #tpu.memory_space<vmem>>, %arg6: memref<4x1x8xf32, #tpu.memory_space<vmem>>, %arg7: memref<4x1x8xf32, #tpu.memory_space<vmem>>, %arg8: memref<4x8x32xbf16, #tpu.memory_space<vmem>>, %arg9: memref<1x32xf32, #tpu.memory_space<vmem>>, %arg10: memref<1x8x32xf32, #tpu.memory_space<vmem>>) attributes {dimension_semantics = [#tpu.dimension_semantics<parallel>], iteration_bounds = array<i64: 2>, scalar_prefetch = 0 : i64, scratch_operands = 0 : i64, tpu.core_type = #tpu.core_type<tc>, window_params = [{transform_indices = @transform_0, window_bounds = array<i64: 1, 8, 32>}, {pipeline_mode = #tpu.pipeline_mode<synchronous>, transform_indices = @transform_1, window_bounds = array<i64: 4, 32, 8>}, {pipeline_mode = #tpu.pipeline_mode<synchronous>, transform_indices = @transform_2, window_bounds = array<i64: 4, 32, 8>}, {pipeline_mode = #tpu.pipeline_mode<synchronous>, transform_indices = @transform_3, window_bounds = array<i64: 4, 32, 8>}, {pipeline_mode = #tpu.pipeline_mode<synchronous>, transform_indices = @transform_4, window_bounds = array<i64: 4, 1, 8>}, {pipeline_mode = #tpu.pipeline_mode<synchronous>, transform_indices = @transform_5, window_bounds = array<i64: 4, 1, 8>}, {pipeline_mode = #tpu.pipeline_mode<synchronous>, transform_indices = @transform_6, window_bounds = array<i64: 4, 1, 8>}, {pipeline_mode = #tpu.pipeline_mode<synchronous>, transform_indices = @transform_7, window_bounds = array<i64: 4, 8, 32>}, {pipeline_mode = #tpu.pipeline_mode<synchronous>, transform_indices = @transform_8, window_bounds = array<i64: 1, 32>}, {transform_indices = @transform_9, window_bounds = array<i64: 1, 8, 32>}]} {
    %c0 = arith.constant 0 : index
    %c0_0 = arith.constant 0 : index
    %c0_1 = arith.constant 0 : index
    %0 = vector.load %arg1[%c0, %c0_0, %c0_1] : memref<1x8x32xf32, #tpu.memory_space<vmem>>, vector<1x8x32xf32>
    %1 = vector.shape_cast %0 : vector<1x8x32xf32> to vector<8x32xf32>
    %2 = arith.truncf %1 : vector<8x32xf32> to vector<8x32xbf16>
    %3 = vector.shape_cast %2 : vector<8x32xbf16> to vector<1x8x32xbf16>
    %4 = vector.broadcast %3 : vector<1x8x32xbf16> to vector<4x8x32xbf16>
    %c0_2 = arith.constant 0 : index
    %c0_3 = arith.constant 0 : index
    %c0_4 = arith.constant 0 : index
    %5 = vector.load %arg2[%c0_2, %c0_3, %c0_4] : memref<4x32x8xbf16, #tpu.memory_space<vmem>>, vector<4x32x8xbf16>
    "tpu.trace_start"() <{level = 10 : i32, message = "htc,hcd->htd"}> : () -> ()
    %cst = arith.constant dense<0.000000e+00> : vector<4x8x8xf32>
    %6 = tpu.matmul %4, %5, %cst {dimension_numbers = #tpu.dot_dimension_numbers<[2], [1], [1], [2], [0, 0, 0, 1, 1, 2], [0], [0]>} : vector<4x8x32xbf16>, vector<4x32x8xbf16>, vector<4x8x8xf32> -> vector<4x8x8xf32>
    "tpu.trace_stop"() : () -> ()
    %c0_5 = arith.constant 0 : index
    %c0_6 = arith.constant 0 : index
    %c0_7 = arith.constant 0 : index
    %7 = vector.load %arg5[%c0_5, %c0_6, %c0_7] : memref<4x1x8xf32, #tpu.memory_space<vmem>>, vector<4x1x8xf32>
    %8 = vector.broadcast %7 : vector<4x1x8xf32> to vector<4x8x8xf32>
    %9 = arith.addf %6, %8 : vector<4x8x8xf32>
    %c0_8 = arith.constant 0 : index
    %c0_9 = arith.constant 0 : index
    %c0_10 = arith.constant 0 : index
    %10 = vector.load %arg3[%c0_8, %c0_9, %c0_10] : memref<4x32x8xbf16, #tpu.memory_space<vmem>>, vector<4x32x8xbf16>
    "tpu.trace_start"() <{level = 10 : i32, message = "htc,hcd->htd"}> : () -> ()
    %cst_11 = arith.constant dense<0.000000e+00> : vector<4x8x8xf32>
    %11 = tpu.matmul %4, %10, %cst_11 {dimension_numbers = #tpu.dot_dimension_numbers<[2], [1], [1], [2], [0, 0, 0, 1, 1, 2], [0], [0]>} : vector<4x8x32xbf16>, vector<4x32x8xbf16>, vector<4x8x8xf32> -> vector<4x8x8xf32>
    "tpu.trace_stop"() : () -> ()
    %c0_12 = arith.constant 0 : index
    %c0_13 = arith.constant 0 : index
    %c0_14 = arith.constant 0 : index
    %12 = vector.load %arg6[%c0_12, %c0_13, %c0_14] : memref<4x1x8xf32, #tpu.memory_space<vmem>>, vector<4x1x8xf32>
    %13 = vector.broadcast %12 : vector<4x1x8xf32> to vector<4x8x8xf32>
    %14 = arith.addf %11, %13 : vector<4x8x8xf32>
    %c0_15 = arith.constant 0 : index
    %c0_16 = arith.constant 0 : index
    %c0_17 = arith.constant 0 : index
    %15 = vector.load %arg4[%c0_15, %c0_16, %c0_17] : memref<4x32x8xbf16, #tpu.memory_space<vmem>>, vector<4x32x8xbf16>
    "tpu.trace_start"() <{level = 10 : i32, message = "htc,hcd->htd"}> : () -> ()
    %cst_18 = arith.constant dense<0.000000e+00> : vector<4x8x8xf32>
    %16 = tpu.matmul %4, %15, %cst_18 {dimension_numbers = #tpu.dot_dimension_numbers<[2], [1], [1], [2], [0, 0, 0, 1, 1, 2], [0], [0]>} : vector<4x8x32xbf16>, vector<4x32x8xbf16>, vector<4x8x8xf32> -> vector<4x8x8xf32>
    "tpu.trace_stop"() : () -> ()
    %c0_19 = arith.constant 0 : index
    %c0_20 = arith.constant 0 : index
    %c0_21 = arith.constant 0 : index
    %17 = vector.load %arg7[%c0_19, %c0_20, %c0_21] : memref<4x1x8xf32, #tpu.memory_space<vmem>>, vector<4x1x8xf32>
    %18 = vector.broadcast %17 : vector<4x1x8xf32> to vector<4x8x8xf32>
    %19 = arith.addf %16, %18 : vector<4x8x8xf32>
    %20 = arith.truncf %9 : vector<4x8x8xf32> to vector<4x8x8xbf16>
    %21 = arith.truncf %14 : vector<4x8x8xf32> to vector<4x8x8xbf16>
    "tpu.trace_start"() <{level = 10 : i32, message = "htd,hsd->hts"}> : () -> ()
    %cst_22 = arith.constant dense<0.000000e+00> : vector<4x8x8xf32>
    %22 = tpu.matmul %20, %21, %cst_22 {dimension_numbers = #tpu.dot_dimension_numbers<[2], [2], [1], [1], [0, 0, 0, 1, 1, 1], [0], [0]>} : vector<4x8x8xbf16>, vector<4x8x8xbf16>, vector<4x8x8xf32> -> vector<4x8x8xf32>
    "tpu.trace_stop"() : () -> ()
    %cst_23 = arith.constant 0.353553385 : f32
    %23 = vector.broadcast %cst_23 : f32 to vector<4x8x8xf32>
    %24 = arith.mulf %22, %23 : vector<4x8x8xf32>
    %25 = tpu.iota {dimensions = array<i32: 1>} : vector<4x8x8xi32>
    %26 = tpu.iota {dimensions = array<i32: 2>} : vector<4x8x8xi32>
    %27 = arith.cmpi sle, %26, %25 : vector<4x8x8xi32>
    %cst_24 = arith.constant -1.000000e+30 : f32
    %28 = vector.broadcast %cst_24 : f32 to vector<4x8x8xf32>
    %29 = arith.select %27, %24, %28 : vector<4x8x8xi1>, vector<4x8x8xf32>
    %cst_25 = arith.constant dense<0xFF800000> : vector<4x8xf32>
    %30 = vector.multi_reduction <maximumf>, %29, %cst_25 [2] : vector<4x8x8xf32> to vector<4x8xf32>
    %31 = vector.shape_cast %30 : vector<4x8xf32> to vector<4x8x1xf32>
    %32 = vector.broadcast %31 : vector<4x8x1xf32> to vector<4x8x8xf32>
    %33 = arith.subf %29, %32 : vector<4x8x8xf32>
    %34 = math.exp %33 : vector<4x8x8xf32>
    %cst_26 = arith.constant dense<0.000000e+00> : vector<4x8xf32>
    %35 = vector.multi_reduction <add>, %34, %cst_26 [2] : vector<4x8x8xf32> to vector<4x8xf32>
    %36 = vector.shape_cast %35 : vector<4x8xf32> to vector<4x8x1xf32>
    %37 = tpu.reciprocal %36 {approx = true} : vector<4x8x1xf32> -> vector<4x8x1xf32>
    %38 = arith.truncf %34 : vector<4x8x8xf32> to vector<4x8x8xbf16>
    %39 = arith.truncf %19 : vector<4x8x8xf32> to vector<4x8x8xbf16>
    "tpu.trace_start"() <{level = 10 : i32, message = "hts,hsd->htd"}> : () -> ()
    %cst_27 = arith.constant dense<0.000000e+00> : vector<4x8x8xf32>
    %40 = tpu.matmul %38, %39, %cst_27 {dimension_numbers = #tpu.dot_dimension_numbers<[2], [1], [1], [2], [0, 0, 0, 1, 1, 2], [0], [0]>} : vector<4x8x8xbf16>, vector<4x8x8xbf16>, vector<4x8x8xf32> -> vector<4x8x8xf32>
    "tpu.trace_stop"() : () -> ()
    %41 = vector.broadcast %37 : vector<4x8x1xf32> to vector<4x8x8xf32>
    %42 = arith.mulf %40, %41 : vector<4x8x8xf32>
    %43 = arith.truncf %42 : vector<4x8x8xf32> to vector<4x8x8xbf16>
    %c0_28 = arith.constant 0 : index
    %c0_29 = arith.constant 0 : index
    %c0_30 = arith.constant 0 : index
    %44 = vector.load %arg8[%c0_28, %c0_29, %c0_30] : memref<4x8x32xbf16, #tpu.memory_space<vmem>>, vector<4x8x32xbf16>
    "tpu.trace_start"() <{level = 10 : i32, message = "htd,hdc->htc"}> : () -> ()
    %cst_31 = arith.constant dense<0.000000e+00> : vector<4x8x32xf32>
    %45 = tpu.matmul %43, %44, %cst_31 {dimension_numbers = #tpu.dot_dimension_numbers<[2], [1], [1], [2], [0, 0, 0, 1, 1, 2], [0], [0]>} : vector<4x8x8xbf16>, vector<4x8x32xbf16>, vector<4x8x32xf32> -> vector<4x8x32xf32>
    "tpu.trace_stop"() : () -> ()
    %cst_32 = arith.constant dense<0.000000e+00> : vector<8x32xf32>
    %46 = vector.multi_reduction <add>, %45, %cst_32 [0] : vector<4x8x32xf32> to vector<8x32xf32>
    %c0_33 = arith.constant 0 : index
    %c0_34 = arith.constant 0 : index
    %47 = vector.load %arg9[%c0_33, %c0_34] : memref<1x32xf32, #tpu.memory_space<vmem>>, vector<1x32xf32>
    %48 = vector.broadcast %47 : vector<1x32xf32> to vector<8x32xf32>
    %49 = arith.addf %46, %48 : vector<8x32xf32>
    %c0_35 = arith.constant 0 : index
    %c0_36 = arith.constant 0 : index
    %c0_37 = arith.constant 0 : index
    %50 = vector.load %arg10[%c0_35, %c0_36, %c0_37] : memref<1x8x32xf32, #tpu.memory_space<vmem>>, vector<1x8x32xf32>
    %51 = vector.shape_cast %50 : vector<1x8x32xf32> to vector<8x32xf32>
    %52 = vector.shape_cast %49 : vector<8x32xf32> to vector<1x8x32xf32>
    tpu.vector_store %arg10[%c0_35, %c0_36, %c0_37], %52 {strides = array<i32>} : memref<1x8x32xf32, #tpu.memory_space<vmem>>, vector<1x8x32xf32>,
    return
  }
  func.func @transform_0(%arg0: i32) -> (i32, i32, i32) {
    %c0_i32 = arith.constant 0 : i32
    %c0_i32_0 = arith.constant 0 : i32
    %c0_i32_1 = arith.constant 0 : i32
    return %arg0, %c0_i32, %c0_i32_0 : i32, i32, i32
  }
  func.func @transform_1(%arg0: i32) -> (i32, i32, i32) {
    %c0_i32 = arith.constant 0 : i32
    %c0_i32_0 = arith.constant 0 : i32
    %c0_i32_1 = arith.constant 0 : i32
    %c0_i32_2 = arith.constant 0 : i32
    return %c0_i32, %c0_i32_0, %c0_i32_1 : i32, i32, i32
  }
  func.func @transform_2(%arg0: i32) -> (i32, i32, i32) {
    %c0_i32 = arith.constant 0 : i32
    %c0_i32_0 = arith.constant 0 : i32
    %c0_i32_1 = arith.constant 0 : i32
    %c0_i32_2 = arith.constant 0 : i32
    return %c0_i32, %c0_i32_0, %c0_i32_1 : i32, i32, i32
  }
  func.func @transform_3(%arg0: i32) -> (i32, i32, i32) {
    %c0_i32 = arith.constant 0 : i32
    %c0_i32_0 = arith.constant 0 : i32
    %c0_i32_1 = arith.constant 0 : i32
    %c0_i32_2 = arith.constant 0 : i32
    return %c0_i32, %c0_i32_0, %c0_i32_1 : i32, i32, i32
  }
  func.func @transform_4(%arg0: i32) -> (i32, i32, i32) {
    %c0_i32 = arith.constant 0 : i32
    %c0_i32_0 = arith.constant 0 : i32
    %c0_i32_1 = arith.constant 0 : i32
    %c0_i32_2 = arith.constant 0 : i32
    return %c0_i32, %c0_i32_0, %c0_i32_1 : i32, i32, i32
  }
  func.func @transform_5(%arg0: i32) -> (i32, i32, i32) {
    %c0_i32 = arith.constant 0 : i32
    %c0_i32_0 = arith.constant 0 : i32
    %c0_i32_1 = arith.constant 0 : i32
    %c0_i32_2 = arith.constant 0 : i32
    return %c0_i32, %c0_i32_0, %c0_i32_1 : i32, i32, i32
  }
  func.func @transform_6(%arg0: i32) -> (i32, i32, i32) {
    %c0_i32 = arith.constant 0 : i32
    %c0_i32_0 = arith.constant 0 : i32
    %c0_i32_1 = arith.constant 0 : i32
    %c0_i32_2 = arith.constant 0 : i32
    return %c0_i32, %c0_i32_0, %c0_i32_1 : i32, i32, i32
  }
  func.func @transform_7(%arg0: i32) -> (i32, i32, i32) {
    %c0_i32 = arith.constant 0 : i32
    %c0_i32_0 = arith.constant 0 : i32
    %c0_i32_1 = arith.constant 0 : i32
    %c0_i32_2 = arith.constant 0 : i32
    return %c0_i32, %c0_i32_0, %c0_i32_1 : i32, i32, i32
  }
  func.func @transform_8(%arg0: i32) -> (i32, i32) {
    %c0_i32 = arith.constant 0 : i32
    %c0_i32_0 = arith.constant 0 : i32
    %c0_i32_1 = arith.constant 0 : i32
    return %c0_i32, %c0_i32_0 : i32, i32
  }
  func.func @transform_9(%arg0: i32) -> (i32, i32, i32) {
    %c0_i32 = arith.constant 0 : i32
    %c0_i32_0 = arith.constant 0 : i32
    %c0_i32_1 = arith.constant 0 : i32
    return %arg0, %c0_i32, %c0_i32_0 : i32, i32, i32
  }
}

</mosaic_0001>

<bundles_post_ra>
// kernel: tpu_custom_call.1
= control target key start
LH: loop header
LB: loop body
LE: loop exit
PB: predicated region body
PF: predicated region fallthrough
CT: control target
= control target key end

     0   :  { %14 = vsyncpa [#allocation3], 0  ;;  %s1727_s0 = inlined_call_operand.vmem [shape: f32[2,8,32], index: 0, kind: input, shape index: {}]   ;;  %s1728_s1 = inlined_call_operand.vmem [shape: bf16[4,32,8], index: 1, kind: input, shape index: {}]   ;;  %s1729_s2 = inlined_call_operand.vmem [shape: bf16[4,32,8], index: 2, kind: input, shape index: {}]   ;;  %s1730_s3 = inlined_call_operand.vmem [shape: bf16[4,32,8], index: 3, kind: input, shape index: {}]   ;;  %s1731_s4 = inlined_call_operand.vmem [shape: f32[4,1,8], index: 4, kind: input, shape index: {}]   ;;  %s1732_s5 = inlined_call_operand.vmem [shape: f32[4,1,8], index: 5, kind: input, shape index: {}]   ;;  %s1733_s6 = inlined_call_operand.vmem [shape: f32[4,1,8], index: 6, kind: input, shape index: {}]   ;;  %s1734_s7 = inlined_call_operand.vmem [shape: bf16[4,8,32], index: 7, kind: input, shape index: {}]   ;;  %s1735_s8 = inlined_call_operand.vmem [shape: f32[1,32], index: 8, kind: input, shape index: {}]   ;;  %s1736_s9 = inlined_call_operand.hbm [shape: f32[2,8,32], index: 9, kind: output, shape index: {}]  }
   0x1   :  { %16 = vsyncpa [#allocation3 + $0x1], 0  ;;  %s1466_s30 = smov 0   ;;  %s1468_s10 = smov 0  }
   0x2   :  { %s1470_s11 = smov 0   ;;  %s1472_s12 = smov 0  }
   0x3 LB: > { %1738 = sst [smem:[#allocation5_spill]] %s1410_s11  ;;  %s1487_s13 = sadd.s32 4294967295, %s1414_s12   ;;  %s1414_s12 = sphi %s1472_s12, %s1746_s12   ;;  %s1410_s11 = sphi %s1470_s11, %s1743_s11   ;;  %s1406_s10 = sphi %s1468_s10, %s1745_s10   ;;  %s1402_s30 = sphi %s1466_s30, %s1744_s30  }
   0x4   : > { %s1130_s14 = sadd.s32 4294967294, %s1414_s12   ;;  %s1491_s15 = sadd.s32 1, %s1414_s12  }
   0x5   : > { %s223_s16 = sadd.s32 1, %s1410_s11  ;;  %s220_s17 = ssub.s32 %s1414_s12, %s1491_s15 }
   0x6   : > { %p233_p0 = scmp.ne.s32.totalorder %s1410_s11, %s1406_s10  ;;  %p221_p1 = scmp.eq.s32.totalorder %s220_s17, 0 }
   0x7   : > { %p234_p2 = scmp.eq.s32.totalorder %s1487_s13, 1  ;;  %p239_p3 = scmp.ne.s32.totalorder %s1406_s10, %s1402_s30 }
   0x8   : > { %p240_p4 = scmp.eq.s32.totalorder %s1130_s14, 1  ;;  %p1133_p7 = scmp.ge.s32.totalorder %s1414_s12, 1 }
   0x9   : > { %s1502_s18 = scalar_select %p221_p1, %s1410_s11, %s223_s16  }
   0xa   : > { %p1504_p5 = por %p234_p2, %p233_p0  ;;  %p1508_p6 = por %p240_p4, %p239_p3 }
   0xb   : > { %1739 = sst [smem:[#allocation6_spill]] %s1502_s18  ;;  %p289_p8 = scmp.lt.s32.totalorder %s1414_s12, 3 }
   0xd   : > { %p290_p9 = pnand %p1133_p7, %p289_p8 }
   0xe   : > { %p324_p10 = scmp.lt.s32.totalorder (!%p290_p9), %s1487_s13, 1  ;;  %s1257_s27 = sshll.u32 (!%p290_p9), %s1487_s13, 3 }
   0xf   : > { %293 = sbr.rel (%p290_p9) target bundleno = 739 (0x2e3), region = 56 }
  0x14   : > { %v1261_v0 = vld [vmem:[%s1728_s1 + $0x8] sm:$0xff]  ;;  %v1263_v1 = vld [vmem:[%s1728_s1 + $0x18] sm:$0xff]  ;;  %v1260_v4 = vld [vmem:[%s1728_s1] sm:$0xff]  ;;  %s325_s21 = scalar_select %p324_p10, %s1487_s13, 1  ;;  %vm375_vm0 = vcmask 261120   ;;  %vm739_vm1 = vcmask 64512  }
  0x15   : > { %v1265_v2 = vld [vmem:[%s1728_s1 + $0x28] sm:$0xff]  ;;  %v1267_v3 = vld [vmem:[%s1728_s1 + $0x38] sm:$0xff]  ;;  %385 = vmatpush.bf16.msra.mxu0 %v1261_v0  ;;  %410 = vmatpush.bf16.msra.mxu1 %v1263_v1  ;;  %v1262_v5 = vld [vmem:[%s1728_s1 + $0x10] sm:$0xff]  ;;  %vm880_vm2 = vcmask 1043456  }
  0x16   : > { %435 = vmatpush.bf16.msra.mxu2 %v1265_v2  ;;  %460 = vmatpush.bf16.msra.mxu3 %v1267_v3  ;;  %v1264_v6 = vld [vmem:[%s1728_s1 + $0x20] sm:$0xff]  ;;  %v1266_v7 = vld [vmem:[%s1728_s1 + $0x30] sm:$0xff]  ;;  %s1135_s26 = sshll.u32 %s325_s21, 3  ;;  %v1269_v8 = vld [vmem:[%s1729_s2 + $0x8] sm:$0xff]  ;;  %s321_s21 = sand.u32 1, %s1406_s10  }
  0x17   : > { %v1271_v9 = vld [vmem:[%s1729_s2 + $0x18] sm:$0xff]  ;;  %s327_s18 = scalar_lea.vmem %s1727_s0, %s1135_s26  ;;  %v1273_v10 = vld [vmem:[%s1729_s2 + $0x28] sm:$0xff]  ;;  %v1268_v13 = vld [vmem:[%s1729_s2] sm:$0xff]  ;;  %s1134_s25 = sshll.u32 %s321_s21, 3 }
  0x18   : > { %v1275_v11 = vld [vmem:[%s1729_s2 + $0x38] sm:$0xff]  ;;  %v329_v12 = vld [vmem:[%s327_s18] sm:$0xff]  ;;  %v1270_v14 = vld [vmem:[%s1729_s2 + $0x10] sm:$0xff]  ;;  %s1066_s18 = scalar_lea.hbm %s1736_s9, %s1257_s27  ;;  %s323_s13 = scalar_lea.vmem [#allocation2], %s1134_s25 }
  0x19   : > { %386 = vmatpush.bf16.msra.mxu0 %v1260_v4  ;;  %411 = vmatpush.bf16.msra.mxu1 %v1262_v5  ;;  %v330_v15 = vpack.c.bf16 %v329_v12, %v329_v12  ;;  %v1272_v16 = vld [vmem:[%s1729_s2 + $0x20] sm:$0xff]  ;;  %v1274_v17 = vld [vmem:[%s1729_s2 + $0x30] sm:$0xff]  ;;  %v1281_v18 = vld [vmem:[%s1730_s3 + $0x28] sm:$0xff]  ;;  %s1068_s14 = sshll.u32 %s323_s13, 4  ;;  %s1070_s16 = sshll.u32 %s1066_s18, 4  ;;  %s1069_s14 = int_to_ptr.vmem [resolvable:$true] %s1068_s14  ;;  %s1071_s16 = int_to_ptr.hbm [resolvable:$true] %s1070_s16 }
  0x1a   : > { %436 = vmatpush.bf16.msra.mxu2 %v1264_v6  ;;  %461 = vmatpush.bf16.msra.mxu3 %v1266_v7  ;;  %v1277_v19 = vld [vmem:[%s1730_s3 + $0x8] sm:$0xff]  ;;  %v1279_v20 = vld [vmem:[%s1730_s3 + $0x18] sm:$0xff]  ;;  %v1280_v21 = vld [vmem:[%s1730_s3 + $0x20] sm:$0xff]  ;;  %s1056_s17 = scalar_lea.sflag [#allocation3], %s321_s21  ;;  %s1366_s22 = sshra.s32 %s1071_s16, 4  ;;  %s1367_s22 = int_to_ptr.hbm [resolvable:$true] %s1366_s22 }
  0x1b   : > { %v1276_v22 = vld [vmem:[%s1730_s3] sm:$0xff]  ;;  %v1278_v23 = vld [vmem:[%s1730_s3 + $0x10] sm:$0xff]  ;;  %v1283_v24 = vld [vmem:[%s1730_s3 + $0x38] sm:$0xff]  ;;  %s1368_s23 = scalar_lea.hbm %s1367_s22, 8  ;;  %s1372_s25 = scalar_lea.hbm %s1736_s9, 16 }
  0x1c   : > { %1144 = vmatmul.msk.bf16.vlgmr.msra.gmra.mxu0 %vm375_vm0, %v330_v15  ;;  %1153 = vmatmul.msk.bf16.vlgmr.msra.gmra.mxu1 %vm375_vm0, %v330_v15  ;;  %v1282_v25 = vld [vmem:[%s1730_s3 + $0x30] sm:$0xff]  ;;  %v1327_v32 = vld [vmem:[%s1732_s5] ss:$0 sm:$0xff]  ;;  %v1328_v33 = vld [vmem:[%s1732_s5 + $0x1] ss:$0 sm:$0xff]  ;;  %p1369_p11 = scmp.ne.s32.totalorder %s1367_s22, %s1368_s23  ;;  %p1373_p0 = scmp.lt.s32.totalorder %s1367_s22, %s1736_s9 }
  0x1d   : > { %517 = vmatpush.bf16.msrb.mxu0 %v1269_v8  ;;  %542 = vmatpush.bf16.msrb.mxu1 %v1271_v9  ;;  %v1324_v40 = vld [vmem:[%s1731_s4 + $0x1] ss:$0 sm:$0xff]  ;;  %v1323_v43 = vld [vmem:[%s1731_s4] ss:$0 sm:$0xff]  ;;  %v1329_v44 = vld [vmem:[%s1732_s5 + $0x2] ss:$0 sm:$0xff]  ;;  %p1374_p1 = scmp.lt.s32.totalorder %s1372_s25, %s1368_s23 }
  0x1e   : > { %1162 = vmatmul.msk.bf16.vlgmr.msra.gmra.mxu2 %vm375_vm0, %v330_v15  ;;  %1171 = vmatmul.msk.bf16.vlgmr.msra.gmra.mxu3 %vm375_vm0, %v330_v15  ;;  %v1330_v45 = vld [vmem:[%s1732_s5 + $0x3] ss:$0 sm:$0xff]  ;;  %v1325_v57 = vld [vmem:[%s1731_s4 + $0x2] ss:$0 sm:$0xff]  ;;  %v1331_v6 = vld [vmem:[%s1733_s6] ss:$0 sm:$0xff]  ;;  %p1370_p12 = pnand %p1369_p11, %p1504_p5 }
  0x1f   : > { %567 = vmatpush.bf16.msrb.mxu2 %v1273_v10  ;;  %592 = vmatpush.bf16.msrb.mxu3 %v1275_v11  ;;  %v1326_v58 = vld [vmem:[%s1731_s4 + $0x3] ss:$0 sm:$0xff]  ;;  %v1332_v7 = vld [vmem:[%s1733_s6 + $0x1] ss:$0 sm:$0xff]  ;;  %v1333_v12 = vld [vmem:[%s1733_s6 + $0x2] ss:$0 sm:$0xff]  ;;  %p1375_p2 = por %p1374_p1, %p1373_p0 }
  0x20   : > { %p1371_p13 = pneg %p1370_p12 }
  0x21   : > { %518 = vmatpush.bf16.msrb.mxu0 %v1268_v13  ;;  %543 = vmatpush.bf16.msrb.mxu1 %v1270_v14 }
  0x22   : > { %p1376_p3 = pnand %p1375_p2, %p1371_p13 }
  0x23   : > { %568 = vmatpush.bf16.msrb.mxu2 %v1272_v16  ;;  %593 = vmatpush.bf16.msrb.mxu3 %v1274_v17 }
  0x25   : > { %649 = vmatpush.bf16.msra.mxu0 %v1277_v19  ;;  %674 = vmatpush.bf16.msra.mxu1 %v1279_v20 }
  0x27   : > { %699 = vmatpush.bf16.msra.mxu2 %v1281_v18  ;;  %724 = vmatpush.bf16.msra.mxu3 %v1283_v24 }
  0x29   : > { %650 = vmatpush.bf16.msra.mxu0 %v1276_v22  ;;  %675 = vmatpush.bf16.msra.mxu1 %v1278_v23  ;;  %v1334_v23 = vld [vmem:[%s1733_s6 + $0x3] ss:$0 sm:$0xff] }
  0x2b   : > { %700 = vmatpush.bf16.msra.mxu2 %v1280_v21  ;;  %725 = vmatpush.bf16.msra.mxu3 %v1282_v25 }
  0x2c   : > { %1180 = vmatmul.msk.bf16.vlgmr.msrb.gmra.mxu0 %vm375_vm0, %v330_v15  ;;  %1189 = vmatmul.msk.bf16.vlgmr.msrb.gmra.mxu1 %vm375_vm0, %v330_v15 }
  0x2e   : > { %1198 = vmatmul.msk.bf16.vlgmr.msrb.gmra.mxu2 %vm375_vm0, %v330_v15  ;;  %1207 = vmatmul.msk.bf16.vlgmr.msrb.gmra.mxu3 %vm375_vm0, %v330_v15 }
  0x3c   : > { %1216 = vmatmul.msk.bf16.vlgmr.msra.gmra.mxu0 %vm375_vm0, %v330_v15  ;;  %1225 = vmatmul.msk.bf16.vlgmr.msra.gmra.mxu1 %vm375_vm0, %v330_v15 }
  0x3e   : > { %1234 = vmatmul.msk.bf16.vlgmr.msra.gmra.mxu2 %vm375_vm0, %v330_v15  ;;  %1243 = vmatmul.msk.bf16.vlgmr.msra.gmra.mxu3 %vm375_vm0, %v330_v15 }
  0x99   : > { %v388_v26 = vpop.f32.mrf.mxu0  ;;  %v413_v27 = vpop.f32.mrf.mxu1 }
  0x9a   : > { %v414_v48 = vadd.f32 %v1324_v40, %v413_v27  ;;  %v389_v51 = vadd.f32 %v1323_v43, %v388_v26 }
  0x9c   : > { %v732_v56 = vpack.c.bf16 %v414_v48, %v414_v48  ;;  %v731_v61 = vpack.c.bf16 %v389_v51, %v389_v51 }
  0xa1   : > { %v438_v28 = vpop.f32.mrf.mxu2  ;;  %v463_v29 = vpop.f32.mrf.mxu3 }
  0xa2   : > { %v390_v30 = vpop.f32.mrf.mxu0  ;;  %v415_v31 = vpop.f32.mrf.mxu1  ;;  %v439_v0 = vadd.f32 %v1325_v57, %v438_v28  ;;  %v464_v1 = vadd.f32 %v1326_v58, %v463_v29 }
  0xa3   : > { %v820_v30 = vlaneseq }
  0xa4   : > { %v733_v4 = vpack.c.bf16 %v439_v0, %v439_v0  ;;  %v734_v5 = vpack.c.bf16 %v464_v1, %v464_v1 }
  0xa5   : > { %v821_v31 = vshrl.u32 %v820_v30, 7 }
  0xa9   : > { %v440_v34 = vpop.f32.mrf.mxu2  ;;  %v465_v35 = vpop.f32.mrf.mxu3 }
  0xaa   : > { %v520_v36 = vpop.f32.mrf.mxu0  ;;  %v545_v37 = vpop.f32.mrf.mxu1 }
  0xab   : > { %v521_v38 = vadd.f32 %v1327_v32, %v520_v36  ;;  %v546_v39 = vadd.f32 %v1328_v33, %v545_v37  ;;  %v823_v32 = vand.u32 127, %v820_v30 }
  0xad   : > { %v735_v41 = vpack.c.bf16 %v521_v38, %v521_v38  ;;  %v736_v42 = vpack.c.bf16 %v546_v39, %v546_v39  ;;  %vm824_vm3 = vcmp.le.s32.totalorder %v823_v32, %v821_v31 }
  0xaf   : > { %v744_v46 = vsel %vm739_vm1, %v735_v41, 0  ;;  %v763_v47 = vsel %vm739_vm1, %v736_v42, 0 }
  0xb0   : > { %753 = vmatpush.bf16.xpose.msrb.mxu0 %v744_v46  ;;  %772 = vmatpush.bf16.xpose.msrb.mxu1 %v763_v47 }
  0xb1   : > { %v570_v49 = vpop.f32.mrf.mxu2  ;;  %v595_v50 = vpop.f32.mrf.mxu3 }
  0xb2   : > { %v571_v52 = vadd.f32 %v1329_v44, %v570_v49  ;;  %v596_v53 = vadd.f32 %v1330_v45, %v595_v50  ;;  %v522_v54 = vpop.f32.mrf.mxu0  ;;  %v547_v55 = vpop.f32.mrf.mxu1 }
  0xb4   : > { %v737_v59 = vpack.c.bf16 %v571_v52, %v571_v52  ;;  %v738_v60 = vpack.c.bf16 %v596_v53, %v596_v53 }
  0xb6   : > { %v782_v62 = vsel %vm739_vm1, %v737_v59, 0  ;;  %v801_v63 = vsel %vm739_vm1, %v738_v60, 0 }
  0xb7   : > { %791 = vmatpush.bf16.xpose.msrb.mxu2 %v782_v62  ;;  %810 = vmatpush.bf16.xpose.msrb.mxu3 %v801_v63 }
  0xb8   : > { %1244 = vmatmul.msk.bf16.vlgmr.msrb.gmra.mxu0 %vm739_vm1, %v731_v61  ;;  %1245 = vmatmul.msk.bf16.vlgmr.msrb.gmra.mxu1 %vm739_vm1, %v732_v56 }
  0xb9   : > { %v572_v2 = vpop.f32.mrf.mxu2  ;;  %v597_v3 = vpop.f32.mrf.mxu3 }
  0xba   : > { %v652_v8 = vpop.f32.mrf.mxu0  ;;  %v677_v9 = vpop.f32.mrf.mxu1 }
  0xbb   : > { %v653_v10 = vadd.f32 %v1331_v6, %v652_v8  ;;  %v678_v11 = vadd.f32 %v1332_v7, %v677_v9 }
  0xbd   : > { %v873_v13 = vpack.c.bf16 %v653_v10, %v653_v10  ;;  %v874_v14 = vpack.c.bf16 %v678_v11, %v678_v11 }
  0xbe   : > { %1246 = vmatmul.msk.bf16.vlgmr.msrb.gmra.mxu2 %vm739_vm1, %v733_v4  ;;  %1247 = vmatmul.msk.bf16.vlgmr.msrb.gmra.mxu3 %vm739_vm1, %v734_v5 }
  0xbf   : > { %v882_v16 = vsel %vm880_vm2, %v873_v13, 0  ;;  %v901_v17 = vsel %vm880_vm2, %v874_v14, 0  ;;  %v962_v13 = vld [vmem:[%s1734_s7] sm:$0xf] }
  0xc0   : > { %891 = vmatpush.bf16.msra.mxu0 %v882_v16  ;;  %910 = vmatpush.bf16.msra.mxu1 %v901_v17  ;;  %v970_v14 = vsel %vm880_vm2, %v962_v13, 0  ;;  %v964_v17 = vld [vmem:[%s1734_s7 + $0x8] sm:$0xf] }
  0xc1   : > { %v702_v15 = vpop.f32.mrf.mxu2  ;;  %v727_v24 = vpop.f32.mrf.mxu3 }
  0xc2   : > { %v703_v18 = vadd.f32 %v1333_v12, %v702_v15  ;;  %v654_v20 = vpop.f32.mrf.mxu0  ;;  %v679_v21 = vpop.f32.mrf.mxu1  ;;  %v728_v26 = vadd.f32 %v1334_v23, %v727_v24  ;;  %v963_v15 = vld [vmem:[%s1734_s7 + $0x4] sm:$0xf] }
  0xc3   : > { %v989_v16 = vsel %vm880_vm2, %v963_v15, 0  ;;  %v965_v20 = vld [vmem:[%s1734_s7 + $0xc] sm:$0xf] }
  0xc4   : > { %v875_v19 = vpack.c.bf16 %v703_v18, %v703_v18  ;;  %v876_v27 = vpack.c.bf16 %v728_v26, %v728_v26  ;;  %979 = vmatpush.bf16.msrb.mxu0 %v970_v14  ;;  %998 = vmatpush.bf16.msrb.mxu1 %v989_v16  ;;  %v1008_v18 = vsel %vm880_vm2, %v964_v17, 0  ;;  %v1027_v21 = vsel %vm880_vm2, %v965_v20, 0 }
  0xc6   : > { %v920_v22 = vsel %vm880_vm2, %v875_v19, 0  ;;  %v939_v28 = vsel %vm880_vm2, %v876_v27, 0 }
  0xc7   : > { %929 = vmatpush.bf16.msra.mxu2 %v920_v22  ;;  %948 = vmatpush.bf16.msra.mxu3 %v939_v28 }
  0xc9   : > { %v704_v25 = vpop.f32.mrf.mxu2  ;;  %v729_v29 = vpop.f32.mrf.mxu3 }
  0xcb   : > { %1017 = vmatpush.bf16.msrb.mxu2 %v1008_v18  ;;  %1036 = vmatpush.bf16.msrb.mxu3 %v1027_v21 }
 0x135   : > { %v755_v33 = vpop.f32.mrf.mxu0  ;;  %v774_v34 = vpop.f32.mrf.mxu1 }
 0x136   : > { %v816_v35 = vmul.f32 0.35355338, %v755_v33  ;;  %v817_v38 = vmul.f32 0.35355338, %v774_v34 }
 0x138   : > { %v825_v36 = vsel %vm824_vm3, %v816_v35, -1e+30  ;;  %v826_v41 = vsel %vm824_vm3, %v817_v38, -1e+30 }
 0x139   : > { %v829_v37 = vsel %vm739_vm1, %v825_v36, -inf  ;;  %v832_v44 = vsel %vm739_vm1, %v826_v41, -inf }
 0x13a   : > { %830 = vmax.xlane.f32.xlu1 %v829_v37 }
 0x13d   : > { %v757_v39 = vpop.f32.mrf.mxu0  ;;  %v776_v40 = vpop.f32.mrf.mxu1 }
 0x141   : > { %v793_v42 = vpop.f32.mrf.mxu2  ;;  %v812_v43 = vpop.f32.mrf.mxu3 }
 0x142   : > { %v818_v45 = vmul.f32 0.35355338, %v793_v42  ;;  %833 = vmax.xlane.f32.xlu1 %v832_v44  ;;  %v819_v48 = vmul.f32 0.35355338, %v812_v43 }
 0x144   : > { %v827_v46 = vsel %vm824_vm3, %v818_v45, -1e+30  ;;  %v828_v51 = vsel %vm824_vm3, %v819_v48, -1e+30 }
 0x145   : > { %v835_v47 = vsel %vm739_vm1, %v827_v46, -inf  ;;  %v838_v52 = vsel %vm739_vm1, %v828_v51, -inf }
 0x146   : > { %836 = vmax.xlane.f32.xlu0 %v835_v47 }
 0x149   : > { %v795_v49 = vpop.f32.mrf.mxu2  ;;  %v814_v50 = vpop.f32.mrf.mxu3 }
 0x14e   : > { %839 = vmax.xlane.f32.xlu0 %v838_v52 }
 0x1ad   : > { %v831_v53 = vpop.xlane.xlu1 %830 }
 0x1ae   : > { %v841_v54 = vsub.f32 %v825_v36, %v831_v53 }
 0x1b0   : > { %v845_v55 = vmul.f32 1.442695, %v841_v54 }
 0x1b2   : > { %1336 = vpow2.f32 %v845_v55 }
 0x1b5   : > { %v834_v56 = vpop.xlane.xlu1 %833 }
 0x1b6   : > { %v842_v57 = vsub.f32 %v826_v41, %v834_v56 }
 0x1b8   : > { %v1337_v58 = vpop.eup %1336  ;;  %v847_v59 = vmul.f32 1.442695, %v842_v57  ;;  %v1335_v57 = vld [vmem:[%s1735_s8] ss:$0 sm:$0xff] }
 0x1b9   : > { %v869_v60 = vpack.c.bf16 %v1337_v58, %v1337_v58  ;;  %v837_v61 = vpop.xlane.xlu0 %836  ;;  %v853_v62 = vsel %vm739_vm1, %v1337_v58, 0.0 }
 0x1ba   : > { %1338 = vpow2.f32 %v847_v59  ;;  %v843_v63 = vsub.f32 %v827_v46, %v837_v61  ;;  %854 = vadd.xlane.f32.xlu0 %v853_v62 }
 0x1bb   : > { %1248 = vmatmul.msk.bf16.vlgmr.msra.gmra.mxu0 %vm739_vm1, %v869_v60 }
 0x1bc   : > { %v849_v0 = vmul.f32 1.442695, %v843_v63 }
 0x1be   : > { %1340 = vpow2.f32 %v849_v0 }
 0x1c0   : > { %v1339_v1 = vpop.eup %1338 }
 0x1c1   : > { %v870_v2 = vpack.c.bf16 %v1339_v1, %v1339_v1  ;;  %v840_v3 = vpop.xlane.xlu0 %839  ;;  %v856_v4 = vsel %vm739_vm1, %v1339_v1, 0.0 }
 0x1c2   : > { %v844_v5 = vsub.f32 %v828_v51, %v840_v3  ;;  %857 = vadd.xlane.f32.xlu1 %v856_v4 }
 0x1c3   : > { %1249 = vmatmul.msk.bf16.vlgmr.msra.gmra.mxu1 %vm739_vm1, %v870_v2 }
 0x1c4   : > { %v1341_v6 = vpop.eup %1340  ;;  %v851_v7 = vmul.f32 1.442695, %v844_v5 }
 0x1c5   : > { %v871_v8 = vpack.c.bf16 %v1341_v6, %v1341_v6  ;;  %v859_v9 = vsel %vm739_vm1, %v1341_v6, 0.0 }
 0x1c6   : > { %1342 = vpow2.f32 %v851_v7  ;;  %860 = vadd.xlane.f32.xlu2 %v859_v9 }
 0x1c7   : > { %1250 = vmatmul.msk.bf16.vlgmr.msra.gmra.mxu2 %vm739_vm1, %v871_v8 }
 0x1cc   : > { %v1343_v10 = vpop.eup %1342 }
 0x1cd   : > { %v872_v11 = vpack.c.bf16 %v1343_v10, %v1343_v10  ;;  %v862_v12 = vsel %vm739_vm1, %v1343_v10, 0.0 }
 0x1ce   : > { %863 = vadd.xlane.f32.xlu2 %v862_v12 }
 0x1cf   : > { %1251 = vmatmul.msk.bf16.vlgmr.msra.gmra.mxu3 %vm739_vm1, %v872_v11 }
 0x22d   : > { %v855_v19 = vpop.xlane.xlu0 %854 }
 0x22e   : > { %1344 = vrcp.f32 %v855_v19 }
 0x234   : > { %v1345_v23 = vpop.eup %1344 }
 0x235   : > { %v858_v22 = vpop.xlane.xlu1 %857 }
 0x236   : > { %1346 = vrcp.f32 %v858_v22 }
 0x238   : > { %v893_v24 = vpop.f32.mrf.mxu0 }
 0x239   : > { %v954_v25 = vmul.f32 %v1345_v23, %v893_v24  ;;  %v861_v27 = vpop.xlane.xlu2 %860 }
 0x23a   : > { %1348 = vrcp.f32 %v861_v27 }
 0x23b   : > { %v958_v26 = vpack.c.bf16 %v954_v25, %v954_v25 }
 0x23c   : > { %v1347_v28 = vpop.eup %1346 }
 0x23d   : > { %1252 = vmatmul.msk.bf16.vlgmr.msrb.gmra.mxu0 %vm739_vm1, %v958_v26 }
 0x240   : > { %v895_v29 = vpop.f32.mrf.mxu0  ;;  %v912_v30 = vpop.f32.mrf.mxu1 }
 0x241   : > { %v955_v31 = vmul.f32 %v1347_v28, %v912_v30  ;;  %v864_v34 = vpop.xlane.xlu2 %863  ;;  %v1349_v35 = vpop.eup %1348 }
 0x242   : > { %1350 = vrcp.f32 %v864_v34 }
 0x243   : > { %v959_v32 = vpack.c.bf16 %v955_v31, %v955_v31 }
 0x245   : > { %1253 = vmatmul.msk.bf16.vlgmr.msrb.gmra.mxu1 %vm739_vm1, %v959_v32 }
 0x248   : > { %v914_v33 = vpop.f32.mrf.mxu1  ;;  %v1351_v39 = vpop.eup %1350 }
 0x24a   : > { %v931_v36 = vpop.f32.mrf.mxu2 }
 0x24b   : > { %v956_v37 = vmul.f32 %v1349_v35, %v931_v36 }
 0x24d   : > { %v960_v38 = vpack.c.bf16 %v956_v37, %v956_v37 }
 0x24f   : > { %1254 = vmatmul.msk.bf16.vlgmr.msrb.gmra.mxu2 %vm739_vm1, %v960_v38 }
 0x252   : > { %v933_v40 = vpop.f32.mrf.mxu2  ;;  %v950_v41 = vpop.f32.mrf.mxu3 }
 0x253   : > { %v957_v42 = vmul.f32 %v1351_v39, %v950_v41 }
 0x255   : > { %v961_v43 = vpack.c.bf16 %v957_v42, %v957_v42 }
 0x257   : > { %1255 = vmatmul.msk.bf16.vlgmr.msrb.gmra.mxu3 %vm739_vm1, %v961_v43 }
 0x25a   : > { %v952_v44 = vpop.f32.mrf.mxu3 }
 0x2ba   : > { %v981_v45 = vpop.f32.mrf.mxu0 }
 0x2bb   : > { %v1042_v51 = vsel %vm375_vm0, %v981_v45, 0.0 }
 0x2c2   : > { %v983_v46 = vpop.f32.mrf.mxu0  ;;  %v1000_v47 = vpop.f32.mrf.mxu1 }
 0x2c3   : > { %v1043_v50 = vsel %vm375_vm0, %v1000_v47, 0.0 }
 0x2c4   : > { %v1044_v53 = vadd.f32 %v1043_v50, %v1042_v51 }
 0x2ca   : > { %v1002_v48 = vpop.f32.mrf.mxu1 }
 0x2d2   : > { %v1019_v49 = vpop.f32.mrf.mxu2 }
 0x2d3   : > { %v1045_v52 = vsel %vm375_vm0, %v1019_v49, 0.0 }
 0x2d4   : > { %v1046_v54 = vadd.f32 %v1045_v52, %v1044_v53 }
 0x2da   : > { %v1021_v55 = vpop.f32.mrf.mxu2  ;;  %v1038_v56 = vpop.f32.mrf.mxu3 }
 0x2db   : > { %v1047_v58 = vsel %vm375_vm0, %v1038_v56, 0.0 }
 0x2dc   : > { %v1048_v59 = vadd.f32 %v1047_v58, %v1046_v54 }
 0x2de   : > { %v1053_v60 = vadd.f32 %v1335_v57, %v1048_v59 }
 0x2e0   : > { %1054 = vst.msk [vmem:[%s323_s13] sm:$0xff] %vm375_vm0, %v1053_v60 }
 0x2e1   : > { %1379 = shalt.err (!%p1376_p3)
}
 0x2e2   : > { %1284 = dma.vmem_to_hbm [thread:$0]  (%p1504_p5), %s1069_s14, 128, %s1071_s16, %s1056_s17   ;;  %v1040_v61 = vpop.f32.mrf.mxu3 }
 0x2e3 PF: > { %p1290_p4 = scmp.ge.s32.totalorder %s1414_s12, 2  ;;  %s1082_s21 = sand.u32 1, %s1402_s30  }
 0x2e4   : > { %s1083_s18 = scalar_lea.sflag [#allocation3], %s1082_s21 }
 0x2e5   : > { %p1287_p7 = pnand %p1290_p4, %p1508_p6 }
 0x2e7   : > { %p1288_p8 = pneg %p1287_p7 }
 0x2e9   : > { %1397 = dma.done.wait (%p1288_p8), %s1083_s18, 128  }
 0x2ea   : > { %1399 = vsyncadd (%p1288_p8), %s1083_s18, 4294967168  ;;  %s1742_s26 = sld [smem:[#allocation5_spill]]  ;;  %p19_p9 = scmp.ge.s32.totalorder %s1491_s15, 4  }
 0x2eb   : > { %s1743_s11 = sld [smem:[#allocation6_spill]]  ;;  %s1744_s30 = smov %s1406_s10 }
 0x2ec   : > { %s1746_s12 = smov %s1491_s15  ;;  %21 = sbr.rel (!%p19_p9) target bundleno = 3 (0x3), region = 91 }
 0x2f0   : > { %s1745_s10 = smov %s1742_s26 }
 0x2f1   :  { %1089 = vsyncpa [#allocation3], 1 }
 0x2f2   :  { %1091 = vsyncpa [#allocation3 + $0x1], 1 }

</bundles_post_ra>
